<compile_context>
chip_gen: v7x
topology: tpu7x:2x2x1
jax: 0.10.0
libtpu: 0.0.40
codegen_flags: <defaults>
</compile_context>

<pallas_src>
import jax
import jax.numpy as jnp
from jax.experimental import pallas as pl
from jax.experimental.pallas import tpu as pltpu


# ------------------------------ kernel bodies --------------------------------


def _precise_reciprocal(d):
    # EUP approximate reciprocal + one Newton-Raphson step: keeps the divide in
    # the (otherwise idle) EUP slot while recovering ~full f32 precision.
    # den >= S / e > 0 so the approximation is numerically safe.
    inv = pl.reciprocal(d, approx=True)
    return inv * (2.0 - d * inv)


def _attention_kernel_stream(x_ref, w_ref, o_ref, num_ref, den_ref):
    # x_ref:   (TB, TS, H)  input tile
    # w_ref:   (1, H)       attention weights (lane-dense, shared)
    # o_ref:   (TB, H)      output tile (same block across the seq grid axis)
    # num_ref: (TB, H) f32  scratch accumulator: sum_s x * exp(tanh(x.w))
    # den_ref: (TB, 1) f32  scratch accumulator: sum_s exp(tanh(x.w))
    k = pl.program_id(1)

    @pl.when(k == 0)
    def _():
        num_ref[...] = jnp.zeros_like(num_ref)
        den_ref[...] = jnp.zeros_like(den_ref)

    # Hoist the f32 cast once for the whole tile (budgeted by the tile chooser).
    xf = x_ref[...].astype(jnp.float32)                       # (TB, TS, H)
    w = w_ref[...].astype(jnp.float32)                        # (1, H)

    # Matvec on the VPU (multiply) + XLU (lane reduce) instead of an N=1 MXU op.
    # TODO(synk): if profiling on v7x shows VALU/XLU slots saturating, move this
    # score matvec onto the idle MXU via a (TB*TS, H) x (H, 128-padded) dot.
    s = jnp.exp(jnp.tanh(jnp.sum(xf * w, axis=-1)))           # (TB, TS)

    # Streaming accumulation over the sequence axis. exp(tanh(.)) is bounded in
    # [1/e, e], so plain f32 accumulation (no online rescaling) is safe.
    num_ref[...] += jnp.sum(xf * s[:, :, None], axis=1)       # (TB, H)
    den_ref[...] += jnp.sum(s, axis=-1, keepdims=True)        # (TB, 1)

    @pl.when(k == pl.num_programs(1) - 1)
    def _():
        inv = _precise_reciprocal(den_ref[...])
        o_ref[...] = (num_ref[...] * inv).astype(o_ref.dtype)


def _attention_kernel_single(x_ref, w_ref, o_ref):
    # Whole sequence in one tile: no scratch accumulators, no init/epilogue.
    xf = x_ref[...].astype(jnp.float32)                       # (TB, S, H)
    w = w_ref[...].astype(jnp.float32)                        # (1, H)
    s = jnp.exp(jnp.tanh(jnp.sum(xf * w, axis=-1)))           # (TB, S)
    num = jnp.sum(xf * s[:, :, None], axis=1)                 # (TB, H)
    den = jnp.sum(s, axis=-1, keepdims=True)                  # (TB, 1)
    o_ref[...] = (num * _precise_reciprocal(den)).astype(o_ref.dtype)


# ------------------------- budgets & tile heuristics --------------------------


def _vmem_limits():
    """Generation-aware (vmem_limit_bytes, usable_budget_bytes).

    v7x has 64 MiB physical VMEM per TensorCore; v5e/v6e have 128 MiB.  Leave
    headroom for compiler-internal scratch, output double-buffering and the
    small accumulators."""
    phys = 64 << 20  # conservative default (v7x-class) if the query fails
    try:
        info = pltpu.get_tpu_info()
        cap = getattr(info, "vmem_capacity_bytes", None)
        if cap:
            phys = int(cap)
    except Exception:
        pass
    if phys <= (64 << 20):      # v7x-class
        limit = 40 << 20
    else:                       # v5e / v6e
        limit = 64 << 20
    budget = (limit * 3) // 4
    return limit, budget


def _divisors_desc(n):
    small, large = [], []
    d = 1
    while d * d <= n:
        if n % d == 0:
            small.append(d)
            if d != n // d:
                large.append(n // d)
        d += 1
    return sorted(small + large, reverse=True)


def _choose_seq_tile(S, H, itemsize, pack, max_row_bytes):
    """Largest divisor of S that keeps a single batch row's tile under
    max_row_bytes, preferring sublane-pack-aligned divisors.  Always bounded:
    never silently falls back to the full sequence."""
    if S * H * itemsize <= max_row_bytes:
        return S
    cap = max(1, max_row_bytes // max(1, H * itemsize))
    divs = _divisors_desc(S)
    for d in divs:                       # prefer sublane-aligned divisors
        if d <= cap and d % pack == 0:
            return d
    for d in divs:                       # bounded fallback (layout padding only)
        if d <= cap:
            return d
    return 1


def _choose_batch_tile(B, TS, H, itemsize, target_tile_bytes):
    """Biggest valid TB (multiple of 8 or exactly B, to satisfy the sublane
    rule for the (TB, H) output block) whose (TB, TS, H) tile fits the target.
    For B >= 16 keep >= 2 grid steps so both v7x TensorCores get work."""
    row_bytes = max(1, TS * H * itemsize)
    cap = max(1, target_tile_bytes // row_bytes)
    if B >= 16:
        cap = min(cap, B // 2)
    candidates = [d for d in _divisors_desc(B) if d == B or d % 8 == 0]
    for d in candidates:
        if d <= cap:
            return d
    # Nothing valid under the cap: smallest valid candidate (bounded by 8 rows
    # or the full batch); correctness over the byte target.
    return min(candidates)


# -------------------------------- entry point ---------------------------------


def attention_forward(x, att_weights, *, force_seq_tile=None, force_batch_tile=None):
    """x: (B, S, H), att_weights: (H, 1) -> (B, H)."""
    B, S, H = x.shape
    w = att_weights.reshape(1, H)                    # lane-dense weight layout
    itemsize = jnp.dtype(x.dtype).itemsize
    pack = max(8, 32 // itemsize)                    # sublane packing: 8/16/32

    vmem_limit, vmem_budget = _vmem_limits()
    # Per-step working set per input-tile element:
    #   2 * itemsize  (double-buffered input DMA)
    #   + 8           (full-tile f32 cast + f32 broadcast temp of x * s)
    bytes_per_elem = 2 * itemsize + 8
    target_tile_bytes = max(itemsize, (vmem_budget // bytes_per_elem) * itemsize)

    tb_candidates = [d for d in _divisors_desc(B) if d == B or d % 8 == 0]
    min_tb = min(tb_candidates)
    max_row_bytes = max(H * itemsize, target_tile_bytes // min_tb)

    if force_seq_tile is not None:
        assert S % force_seq_tile == 0
        TS = int(force_seq_tile)
    else:
        TS = _choose_seq_tile(S, H, itemsize, pack, max_row_bytes)
    if force_batch_tile is not None:
        assert B % force_batch_tile == 0
        TB = int(force_batch_tile)
    else:
        TB = _choose_batch_tile(B, TS, H, itemsize, target_tile_bytes)

    grid_b = B // TB
    grid_k = S // TS

    cost = pl.CostEstimate(
        flops=4 * B * S * H,
        transcendentals=2 * B * S,
        bytes_accessed=B * S * H * itemsize + B * H * itemsize + H * itemsize,
    )

    if grid_k == 1:
        # Whole sequence resident: scratch-free single-step kernel.
        return pl.pallas_call(
            _attention_kernel_single,
            out_shape=jax.ShapeDtypeStruct((B, H), x.dtype),
            grid_spec=pltpu.PrefetchScalarGridSpec(
                num_scalar_prefetch=0,
                grid=(grid_b,),
                in_specs=[
                    pl.BlockSpec((TB, S, H), lambda b: (b, 0, 0)),
                    pl.BlockSpec((1, H), lambda b: (0, 0)),
                ],
                out_specs=pl.BlockSpec((TB, H), lambda b: (b, 0)),
            ),
            compiler_params=pltpu.CompilerParams(
                dimension_semantics=("parallel",),
                vmem_limit_bytes=vmem_limit,
            ),
            cost_estimate=cost,
        )(x, w)

    return pl.pallas_call(
        _attention_kernel_stream,
        out_shape=jax.ShapeDtypeStruct((B, H), x.dtype),
        grid_spec=pltpu.PrefetchScalarGridSpec(
            num_scalar_prefetch=0,
            grid=(grid_b, grid_k),
            in_specs=[
                pl.BlockSpec((TB, TS, H), lambda b, k: (b, k, 0)),
                pl.BlockSpec((1, H), lambda b, k: (0, 0)),
            ],
            out_specs=pl.BlockSpec((TB, H), lambda b, k: (b, 0)),
            scratch_shapes=[
                pltpu.VMEM((TB, H), jnp.float32),   # numerator accumulator
                pltpu.VMEM((TB, 1), jnp.float32),   # denominator accumulator
            ],
        ),
        compiler_params=pltpu.CompilerParams(
            dimension_semantics=("parallel", "arbitrary"),
            vmem_limit_bytes=vmem_limit,
        ),
        cost_estimate=cost,
    )(x, w)


# --------------------------------- reference ----------------------------------


def attention_reference(x, att_weights):
    s = jnp.matmul(x, att_weights)                   # (B, S, 1)
    s = jnp.exp(jnp.tanh(s))
    s = s / jnp.sum(s, axis=1, keepdims=True)
    out = jnp.matmul(jnp.swapaxes(x, 1, 2), s)       # (B, H, 1)
    return out.reshape(x.shape[0], x.shape[2])


if __name__ == "__main__":
    key = jax.random.PRNGKey(0)
    k_x, k_w = jax.random.split(key)

    # Small shapes consistent with the module: batch=2, seq=8, hidden=32.
    B, S, H = 2, 8, 32
    x = jax.random.normal(k_x, (B, S, H), dtype=jnp.float32)
    att_weights = jax.random.normal(k_w, (H, 1), dtype=jnp.float32)  # (hidden, 1)

    out = attention_forward(x, att_weights)
    jax.block_until_ready(out)
    ref = attention_reference(x, att_weights)
    assert out.shape == (B, H)
    assert jnp.allclose(out, ref, atol=1e-5, rtol=1e-5), "mismatch vs reference"

    # Also exercise the streaming (multi-seq-step, accumulator) path.
    B2, S2, H2 = 8, 64, 128
    x2 = jax.random.normal(k_x, (B2, S2, H2), dtype=jnp.float32)
    w2 = jax.random.normal(k_w, (H2, 1), dtype=jnp.float32)
    out2 = attention_forward(x2, w2, force_seq_tile=16, force_batch_tile=8)
    jax.block_until_ready(out2)
    ref2 = attention_reference(x2, w2)
    assert jnp.allclose(out2, ref2, atol=1e-5, rtol=1e-5), "mismatch (streaming path)"

    print("KERNEL_OK")
</pallas_src>

<mosaic_0001>
module attributes {stable_mosaic.version = 11 : i64} {
  func.func @_attention_kernel_single(%arg0: i32, %arg1: memref<2x8x32xf32, #tpu.memory_space<vmem>>, %arg2: memref<1x32xf32, #tpu.memory_space<vmem>>, %arg3: memref<2x32xf32, #tpu.memory_space<vmem>>) attributes {dimension_semantics = [#tpu.dimension_semantics<parallel>], iteration_bounds = array<i64: 1>, scalar_prefetch = 0 : i64, scratch_operands = 0 : i64, tpu.core_type = #tpu.core_type<tc>, window_params = [{transform_indices = @transform_0, window_bounds = array<i64: 2, 8, 32>}, {pipeline_mode = #tpu.pipeline_mode<synchronous>, transform_indices = @transform_1, window_bounds = array<i64: 1, 32>}, {transform_indices = @transform_2, window_bounds = array<i64: 2, 32>}]} {
    %c0 = arith.constant 0 : index
    %c0_0 = arith.constant 0 : index
    %c0_1 = arith.constant 0 : index
    %0 = vector.load %arg1[%c0, %c0_0, %c0_1] : memref<2x8x32xf32, #tpu.memory_space<vmem>>, vector<2x8x32xf32>
    %c0_2 = arith.constant 0 : index
    %c0_3 = arith.constant 0 : index
    %1 = vector.load %arg2[%c0_2, %c0_3] : memref<1x32xf32, #tpu.memory_space<vmem>>, vector<1x32xf32>
    %2 = vector.shape_cast %1 : vector<1x32xf32> to vector<1x1x32xf32>
    %3 = vector.broadcast %2 : vector<1x1x32xf32> to vector<2x8x32xf32>
    %4 = arith.mulf %0, %3 : vector<2x8x32xf32>
    %cst = arith.constant dense<0.000000e+00> : vector<2x8xf32>
    %5 = vector.multi_reduction <add>, %4, %cst [2] : vector<2x8x32xf32> to vector<2x8xf32>
    %6 = math.tanh %5 : vector<2x8xf32>
    %7 = math.exp %6 : vector<2x8xf32>
    %8 = vector.shape_cast %7 : vector<2x8xf32> to vector<2x8x1xf32>
    %9 = vector.broadcast %8 : vector<2x8x1xf32> to vector<2x8x32xf32>
    %10 = arith.mulf %0, %9 : vector<2x8x32xf32>
    %cst_4 = arith.constant dense<0.000000e+00> : vector<2x32xf32>
    %11 = vector.multi_reduction <add>, %10, %cst_4 [1] : vector<2x8x32xf32> to vector<2x32xf32>
    %cst_5 = arith.constant dense<0.000000e+00> : vector<2xf32>
    %12 = vector.multi_reduction <add>, %7, %cst_5 [1] : vector<2x8xf32> to vector<2xf32>
    %13 = vector.shape_cast %12 : vector<2xf32> to vector<2x1xf32>
    %14 = tpu.reciprocal %13 {approx = true} : vector<2x1xf32> -> vector<2x1xf32>
    %15 = arith.mulf %13, %14 : vector<2x1xf32>
    %cst_6 = arith.constant 2.000000e+00 : f32
    %16 = vector.broadcast %cst_6 : f32 to vector<2x1xf32>
    %17 = arith.subf %16, %15 : vector<2x1xf32>
    %18 = arith.mulf %14, %17 : vector<2x1xf32>
    %19 = vector.broadcast %18 : vector<2x1xf32> to vector<2x32xf32>
    %20 = arith.mulf %11, %19 : vector<2x32xf32>
    %c0_7 = arith.constant 0 : index
    %c0_8 = arith.constant 0 : index
    %21 = vector.load %arg3[%c0_7, %c0_8] : memref<2x32xf32, #tpu.memory_space<vmem>>, vector<2x32xf32>
    tpu.vector_store %arg3[%c0_7, %c0_8], %20 {strides = array<i32>} : memref<2x32xf32, #tpu.memory_space<vmem>>, vector<2x32xf32>,
    return
  }
  func.func @transform_0(%arg0: i32) -> (i32, i32, i32) {
    %c0_i32 = arith.constant 0 : i32
    %c0_i32_0 = arith.constant 0 : i32
    %c0_i32_1 = arith.constant 0 : i32
    return %arg0, %c0_i32, %c0_i32_0 : i32, i32, i32
  }
  func.func @transform_1(%arg0: i32) -> (i32, i32) {
    %c0_i32 = arith.constant 0 : i32
    %c0_i32_0 = arith.constant 0 : i32
    %c0_i32_1 = arith.constant 0 : i32
    return %c0_i32, %c0_i32_0 : i32, i32
  }
  func.func @transform_2(%arg0: i32) -> (i32, i32) {
    %c0_i32 = arith.constant 0 : i32
    %c0_i32_0 = arith.constant 0 : i32
    return %arg0, %c0_i32 : i32, i32
  }
}

</mosaic_0001>

<bundles_post_ra>
// kernel: tpu_custom_call.1
= control target key start
LH: loop header
LB: loop body
LE: loop exit
PB: predicated region body
PF: predicated region fallthrough
CT: control target
= control target key end

     0   :  { %7 = vsyncpa [#allocation3], 0  ;;  %s232_s0 = inlined_call_operand.hbm [shape: f32[2,8,32], index: 0, kind: input, shape index: {}]   ;;  %s233_s1 = inlined_call_operand.vmem [shape: f32[1,32], index: 1, kind: input, shape index: {}]   ;;  %s234_s2 = inlined_call_operand.hbm [shape: f32[2,32], index: 2, kind: output, shape index: {}]  }
   0x1   :  { %8 = vsyncpa [#allocation4], 0  ;;  %s180_s9 = smov [#allocation2]   ;;  %s132_s13 = scalar_lea.hbm %s232_s0, 256 }
   0x2   :  { %s14_s10 = sshll.u32 %s180_s9, 4  ;;  %p133_p0 = scmp.ne.s32.totalorder %s232_s0, %s132_s13  ;;  %s15_s10 = int_to_ptr.vmem [resolvable:$true] %s14_s10 }
   0x3   :  { %p136_p1 = scmp.lt.u32.totalorder %s132_s13, %s232_s0 }
   0x5   :  { %p138_p2 = pnand %p136_p1, %p133_p0 }
   0x7   :  { %141 = shalt.err (!%p138_p2)
}
   0x8   :  { %s142_s18 = scalar_lea.vmem %s15_s10, 256  ;;  %p147_p4 = scmp.lt.s32.totalorder %s15_s10, %s15_s10 }
   0x9   :  { %p143_p3 = scmp.ne.s32.totalorder %s15_s10, %s142_s18  ;;  %p148_p5 = scmp.lt.s32.totalorder %s142_s18, %s142_s18 }
   0xb   :  { %p149_p6 = por %p148_p5, %p147_p4 }
   0xd   :  { %p150_p7 = pnand %p149_p6, %p143_p3 }
   0xf   :  { %153 = shalt.err (!%p150_p7)
}
  0x10   :  { %s181_s19 = smov 128   ;;  %s182_s20 = smov 8  }
  0x11   :  { %20 = dma.hbm_to_vmem [thread:$0]  %s232_s0, 256, %s15_s10, [#allocation3], %s181_s19, %s181_s19, %s182_s20  }
  0x12   :  { %176 = dma.done.wait [#allocation3], 256  }
  0x13   :  { %177 = vsyncadd [#allocation3], 4294967040  ;;  %v26_v0 = vld [vmem:[#allocation2] sm:$0xff]  ;;  %vm37_vm0 = vcmask 261120   ;;  %v27_v2 = vld [vmem:[#allocation2 + $0x8] sm:$0xff]  ;;  %v68_v13 = vlaneseq  ;;  %vm78_vm1 = vcmask 1041409  }
  0x14   :  { %v117_v1 = vld [vmem:[%s233_s1] ss:$0 sm:$0xff]  ;;  %vm81_vm2 = vcmask 58368   ;;  %s183_s0 = smov [#allocation5]   ;;  %vm100_vm3 = vcmask 254976  }
  0x15   :  { %v35_v3 = vmul.f32 %v117_v1, %v26_v0  ;;  %v36_v4 = vmul.f32 %v117_v1, %v27_v2  ;;  %v69_v14 = vand.u32 127, %v68_v13  ;;  %v71_v15 = vshrl.u32 %v68_v13, 7  ;;  %s108_s1 = sshll.u32 %s183_s0, 4  ;;  %s109_s1 = int_to_ptr.vmem [resolvable:$true] %s108_s1 }
  0x16   :  { %s154_s25 = scalar_lea.vmem %s109_s1, 32  ;;  %p159_p9 = scmp.lt.s32.totalorder %s109_s1, %s109_s1 }
  0x17   :  { %v38_v5 = vsel %vm37_vm0, %v35_v3, 0.0  ;;  %v41_v6 = vsel %vm37_vm0, %v36_v4, 0.0  ;;  %v72_v16 = vsub.s32 %v69_v14, %v71_v15  ;;  %p155_p8 = scmp.ne.s32.totalorder %s109_s1, %s154_s25  ;;  %p160_p10 = scmp.lt.s32.totalorder %s154_s25, %s154_s25 }
  0x18   :  { %39 = vadd.xlane.f32.xlu0 %v38_v5 }
  0x19   :  { %p161_p11 = por %p160_p10, %p159_p9 }
  0x1b   :  { %p162_p12 = pnand %p161_p11, %p155_p8 }
  0x1c   :  { %42 = vadd.xlane.f32.xlu0 %v41_v6 }
  0xa5   :  { %v40_v7 = vpop.xlane.xlu0 %39 }
  0xa6   :  { %122 = vtanh.f32 %v40_v7 }
  0xa9   :  { %v43_v8 = vpop.xlane.xlu0 %42 }
  0xaa   :  { %124 = vtanh.f32 %v43_v8 }
  0xb0   :  { %v123_v9 = vpop.eup %122 }
  0xb1   :  { %v46_v10 = vmul.f32 1.442695, %v123_v9 }
  0xb3   :  { %126 = vpow2.f32 %v46_v10 }
  0xb4   :  { %v125_v11 = vpop.eup %124 }
  0xb5   :  { %v48_v12 = vmul.f32 1.442695, %v125_v11 }
  0xb7   :  { %128 = vpow2.f32 %v48_v12 }
  0xbd   :  { %v127_v17 = vpop.eup %126 }
  0xbe   :  { %v73_v19 = vrot.slane %v127_v17, %v72_v16  ;;  %v50_v24 = vmul.f32 %v127_v17, %v26_v0 }
  0xc0   :  { %v52_v26 = vsel %vm37_vm0, %v50_v24, 0.0 }
  0xc1   :  { %v129_v18 = vpop.eup %128  ;;  %v53_v28 = vrot.slane %v52_v26, 4 }
  0xc2   :  { %v77_v20 = vrot.slane %v129_v18, %v72_v16  ;;  %v51_v23 = vmul.f32 %v129_v18, %v27_v2 }
  0xc3   :  { %v54_v31 = vadd.f32 %v53_v28, %v52_v26 }
  0xc4   :  { %v79_v21 = vsel %vm78_vm1, %v77_v20, %v73_v19  ;;  %v59_v25 = vsel %vm37_vm0, %v51_v23, 0.0 }
  0xc5   :  { %v82_v22 = vsel %vm81_vm2, %v79_v21, 0.0  ;;  %v60_v27 = vrot.slane %v59_v25, 4  ;;  %v55_v33 = vrot.slane %v54_v31, 2 }
  0xc6   :  { %83 = vadd.xlane.f32.xlu1 %v82_v22 }
  0xc7   :  { %v61_v30 = vadd.f32 %v60_v27, %v59_v25  ;;  %v56_v36 = vadd.f32 %v55_v33, %v54_v31 }
  0xc9   :  { %v62_v32 = vrot.slane %v61_v30, 2  ;;  %v57_v40 = vrot.slane %v56_v36, 1 }
  0xcb   :  { %v63_v34 = vadd.f32 %v62_v32, %v61_v30  ;;  %v58_v44 = vadd.f32 %v57_v40, %v56_v36 }
  0xcd   :  { %v64_v38 = vrot.slane %v63_v34, 1 }
  0xcf   :  { %v65_v42 = vadd.f32 %v64_v38, %v63_v34 }
 0x153   :  { %v84_v29 = vpop.xlane.xlu1 %83 }
 0x154   :  { %130 = vrcp.f32 %v84_v29 }
 0x15e   :  { %v131_v35 = vpop.eup %130 }
 0x15f   :  { %v86_v37 = vmul.f32 %v131_v35, %v84_v29 }
 0x161   :  { %v87_v39 = vsub.f32 2.0, %v86_v37 }
 0x163   :  { %v88_v41 = vmul.f32 %v131_v35, %v87_v39 }
 0x165   :  { %v90_v43 = vrot.slane %v88_v41, 1  ;;  %v93_v46 = vmul.f32 %v88_v41, %v58_v44 }
 0x167   :  { %v94_v45 = vmul.f32 %v90_v43, %v65_v42 }
 0x169   :  { %v97_v47 = vrot.slane %v94_v45, 7 }
 0x16b   :  { %v98_v48 = vsel %vm78_vm1, %v97_v47, %v93_v46 }
 0x16c   :  { %101 = vst.msk [vmem:[#allocation5] sm:$0x3] %vm100_vm3, %v98_v48 }
 0x16d   :  { %165 = shalt.err (!%p162_p12)
}
 0x16e   :  { %s166_s28 = scalar_lea.hbm %s234_s2, 32 }
 0x16f   :  { %p167_p13 = scmp.ne.s32.totalorder %s234_s2, %s166_s28  ;;  %p170_p0 = scmp.lt.u32.totalorder %s166_s28, %s234_s2 }
 0x171   :  { %p172_p1 = pnand %p170_p0, %p167_p13 }
 0x173   :  { %175 = shalt.err (!%p172_p1)
}
 0x174   :  { %111 = dma.vmem_to_hbm [thread:$0]  %s109_s1, 32, %s234_s2, [#allocation4]  }
 0x175   :  { %178 = dma.done.wait [#allocation4], 32  }
 0x176   :  { %179 = vsyncadd [#allocation4], 4294967264 }
 0x177   :  { %115 = vsyncpa [#allocation3], 1 }
 0x178   :  { %116 = vsyncpa [#allocation4], 1 }

</bundles_post_ra>
